<compile_context>
chip_gen: v6e
topology: v6e:2x2x1
jax: 0.10.0
libtpu: 0.0.40
codegen_flags: <defaults>
</compile_context>

<pallas_src>
import jax
import jax.numpy as jnp
from jax import lax
from jax.experimental import pallas as pl
from jax.experimental.pallas import tpu as pltpu


def lpu_forward(x_blc, w_hwc, bias, H, W):
    """x_blc: (B, L, C) with L = H*W; w_hwc: (3, 3, C) depthwise taps; bias: (C,)."""
    B, L, C = x_blc.shape
    assert L == H * W
    WC = W * C

    # Free reshape: (B, H*W, C) row-major == (B, H, W*C) row-major.
    x = x_blc.reshape(B, H, WC).astype(jnp.float32)

    # Fold the residual "+ x" into the center tap, then tile taps/bias along W so each
    # tap is a single (1, W*C) broadcast weight row inside the kernel.
    w = w_hwc.astype(jnp.float32)
    w = w.at[1, 1, :].add(1.0)
    w_taps = jnp.tile(w.reshape(3, 3, 1, C), (1, 1, W, 1)).reshape(9, WC)
    b_row = jnp.tile(bias.astype(jnp.float32).reshape(1, 1, C), (1, W, 1)).reshape(1, WC)

    def kernel(x_ref, w_ref, b_ref, out_ref, xpad_ref):
        # x_ref   : (1, H, W*C)           one batch element, lane-dense
        # w_ref   : (9, W*C)              per-tap weights (residual folded into tap 4)
        # b_ref   : (1, W*C)
        # out_ref : (1, H, W*C)
        # xpad_ref: (H+2, (W+2)*C) VMEM   zero-halo staging buffer
        # Zero only the halo border (interior is fully overwritten below). Done every
        # step so correctness is independent of megacore grid assignment.
        xpad_ref[0:1, :] = jnp.zeros((1, (W + 2) * C), jnp.float32)
        xpad_ref[H + 1:H + 2, :] = jnp.zeros((1, (W + 2) * C), jnp.float32)
        xpad_ref[:, 0:C] = jnp.zeros((H + 2, C), jnp.float32)
        xpad_ref[:, (W + 1) * C:(W + 2) * C] = jnp.zeros((H + 2, C), jnp.float32)

        # Stage the input into the interior of the padded buffer.
        xpad_ref[1:H + 1, C:(W + 1) * C] = x_ref[0]

        # Accumulator starts as the broadcast bias (no separate bias-add pass).
        acc = jnp.broadcast_to(b_ref[...], (H, WC))

        # Depthwise 3x3: nine shifted windows, each a broadcasted VPU multiply-add.
        for dy in range(3):
            for dx in range(3):
                t = dy * 3 + dx
                win = xpad_ref[dy:dy + H, dx * C:dx * C + WC]
                acc = acc + win * w_ref[t:t + 1, :]

        out_ref[0] = acc.astype(out_ref.dtype)

    out = pl.pallas_call(
        kernel,
        out_shape=jax.ShapeDtypeStruct((B, H, WC), jnp.float32),
        grid_spec=pltpu.PrefetchScalarGridSpec(
            num_scalar_prefetch=0,
            grid=(B,),
            in_specs=[
                pl.BlockSpec((1, H, WC), lambda n: (n, 0, 0)),
                pl.BlockSpec((9, WC), lambda n: (0, 0)),
                pl.BlockSpec((1, WC), lambda n: (0, 0)),
            ],
            out_specs=pl.BlockSpec((1, H, WC), lambda n: (n, 0, 0)),
            scratch_shapes=[pltpu.VMEM((H + 2, (W + 2) * C), jnp.float32)],
        ),
        compiler_params=pltpu.CompilerParams(
            dimension_semantics=("parallel",)),
    )(x, w_taps, b_row)

    return out.reshape(B, L, C)


def lpu_reference(x_blc, w_hwc, bias, H, W):
    """Pure-JAX reference (lax depthwise conv) for correctness checking."""
    B, L, C = x_blc.shape
    x = x_blc.reshape(B, H, W, C).astype(jnp.float32)
    w = w_hwc.astype(jnp.float32).reshape(3, 3, 1, C)  # HWIO, I = C/groups = 1
    y = lax.conv_general_dilated(
        x, w, window_strides=(1, 1), padding=((1, 1), (1, 1)),
        dimension_numbers=("NHWC", "HWIO", "NHWC"),
        feature_group_count=C) + bias.astype(jnp.float32)
    y = y + x
    return y.reshape(B, L, C)


def make_params(key, channels):
    k1, k2 = jax.random.split(key)
    scale = 0.1
    # PyTorch depthwise weight layout is (C, 1, 3, 3); convert to (3, 3, C).
    w_torch = scale * jax.random.normal(k1, (channels, 1, 3, 3), jnp.float32)
    w_hwc = jnp.transpose(w_torch[:, 0], (1, 2, 0))
    b = scale * jax.random.normal(k2, (channels,), jnp.float32)
    return w_hwc, b


if __name__ == "__main__":
    key = jax.random.PRNGKey(0)
    kx, kp = jax.random.split(key)

    B, C, H, W = 2, 8, 16, 16          # C=8, W=16 -> lane-dense W*C = 128
    L = H * W
    x = jax.random.normal(kx, (B, L, C), jnp.float32)   # [B, L, C] like the PyTorch module
    w_hwc, b = make_params(kp, C)

    out = jax.block_until_ready(lpu_forward(x, w_hwc, b, H, W))
    ref = jax.block_until_ready(lpu_reference(x, w_hwc, b, H, W))

    assert out.shape == (B, L, C), out.shape
    assert jnp.allclose(out, ref, atol=1e-4, rtol=1e-4), float(jnp.max(jnp.abs(out - ref)))
    print("KERNEL_OK")
</pallas_src>

<mosaic_0001>
module attributes {stable_mosaic.version = 11 : i64} {
  func.func @kernel(%arg0: i32, %arg1: memref<1x16x128xf32, #tpu.memory_space<vmem>>, %arg2: memref<9x128xf32, #tpu.memory_space<vmem>>, %arg3: memref<1x128xf32, #tpu.memory_space<vmem>>, %arg4: memref<1x16x128xf32, #tpu.memory_space<vmem>>, %arg5: memref<18x144xf32, #tpu.memory_space<vmem>>) attributes {dimension_semantics = [#tpu.dimension_semantics<parallel>], iteration_bounds = array<i64: 2>, scalar_prefetch = 0 : i64, scratch_operands = 1 : i64, tpu.core_type = #tpu.core_type<tc>, window_params = [{transform_indices = @transform_0, window_bounds = array<i64: 1, 16, 128>}, {pipeline_mode = #tpu.pipeline_mode<synchronous>, transform_indices = @transform_1, window_bounds = array<i64: 9, 128>}, {pipeline_mode = #tpu.pipeline_mode<synchronous>, transform_indices = @transform_2, window_bounds = array<i64: 1, 128>}, {transform_indices = @transform_3, window_bounds = array<i64: 1, 16, 128>}]} {
    %cst = arith.constant 0.000000e+00 : f32
    %0 = vector.broadcast %cst : f32 to vector<1x144xf32>
    %c0 = arith.constant 0 : index
    %c0_0 = arith.constant 0 : index
    %1 = vector.load %arg5[%c0, %c0_0] : memref<18x144xf32, #tpu.memory_space<vmem>>, vector<1x144xf32>
    tpu.vector_store %arg5[%c0, %c0_0], %0 {strides = array<i32>} : memref<18x144xf32, #tpu.memory_space<vmem>>, vector<1x144xf32>,
    %cst_1 = arith.constant 0.000000e+00 : f32
    %2 = vector.broadcast %cst_1 : f32 to vector<1x144xf32>
    %c17 = arith.constant 17 : index
    %c0_2 = arith.constant 0 : index
    %3 = vector.load %arg5[%c17, %c0_2] : memref<18x144xf32, #tpu.memory_space<vmem>>, vector<1x144xf32>
    tpu.vector_store %arg5[%c17, %c0_2], %2 {strides = array<i32>} : memref<18x144xf32, #tpu.memory_space<vmem>>, vector<1x144xf32>,
    %cst_3 = arith.constant 0.000000e+00 : f32
    %4 = vector.broadcast %cst_3 : f32 to vector<18x8xf32>
    %c0_4 = arith.constant 0 : index
    %c0_5 = arith.constant 0 : index
    %5 = vector.load %arg5[%c0_4, %c0_5] : memref<18x144xf32, #tpu.memory_space<vmem>>, vector<18x8xf32>
    tpu.vector_store %arg5[%c0_4, %c0_5], %4 {strides = array<i32>} : memref<18x144xf32, #tpu.memory_space<vmem>>, vector<18x8xf32>,
    %cst_6 = arith.constant 0.000000e+00 : f32
    %6 = vector.broadcast %cst_6 : f32 to vector<18x8xf32>
    %c0_7 = arith.constant 0 : index
    %c136 = arith.constant 136 : index
    %7 = vector.load %arg5[%c0_7, %c136] : memref<18x144xf32, #tpu.memory_space<vmem>>, vector<18x8xf32>
    tpu.vector_store %arg5[%c0_7, %c136], %6 {strides = array<i32>} : memref<18x144xf32, #tpu.memory_space<vmem>>, vector<18x8xf32>,
    %c0_8 = arith.constant 0 : index
    %c0_9 = arith.constant 0 : index
    %c0_10 = arith.constant 0 : index
    %8 = vector.load %arg1[%c0_8, %c0_9, %c0_10] : memref<1x16x128xf32, #tpu.memory_space<vmem>>, vector<1x16x128xf32>
    %9 = vector.shape_cast %8 : vector<1x16x128xf32> to vector<16x128xf32>
    %c1 = arith.constant 1 : index
    %c8 = arith.constant 8 : index
    %10 = vector.load %arg5[%c1, %c8] : memref<18x144xf32, #tpu.memory_space<vmem>>, vector<16x128xf32>
    tpu.vector_store %arg5[%c1, %c8], %9 {strides = array<i32>} : memref<18x144xf32, #tpu.memory_space<vmem>>, vector<16x128xf32>,
    %c0_11 = arith.constant 0 : index
    %c0_12 = arith.constant 0 : index
    %11 = vector.load %arg3[%c0_11, %c0_12] : memref<1x128xf32, #tpu.memory_space<vmem>>, vector<1x128xf32>
    %12 = vector.shape_cast %11 : vector<1x128xf32> to vector<1x128xf32>
    %13 = vector.broadcast %12 : vector<1x128xf32> to vector<16x128xf32>
    %c0_13 = arith.constant 0 : index
    %c0_14 = arith.constant 0 : index
    %14 = vector.load %arg5[%c0_13, %c0_14] : memref<18x144xf32, #tpu.memory_space<vmem>>, vector<16x128xf32>
    %c0_15 = arith.constant 0 : index
    %c0_16 = arith.constant 0 : index
    %15 = vector.load %arg2[%c0_15, %c0_16] : memref<9x128xf32, #tpu.memory_space<vmem>>, vector<1x128xf32>
    %16 = vector.broadcast %15 : vector<1x128xf32> to vector<16x128xf32>
    %17 = arith.mulf %14, %16 : vector<16x128xf32>
    %18 = arith.addf %13, %17 : vector<16x128xf32>
    %c0_17 = arith.constant 0 : index
    %c8_18 = arith.constant 8 : index
    %19 = vector.load %arg5[%c0_17, %c8_18] : memref<18x144xf32, #tpu.memory_space<vmem>>, vector<16x128xf32>
    %c1_19 = arith.constant 1 : index
    %c0_20 = arith.constant 0 : index
    %20 = vector.load %arg2[%c1_19, %c0_20] : memref<9x128xf32, #tpu.memory_space<vmem>>, vector<1x128xf32>
    %21 = vector.broadcast %20 : vector<1x128xf32> to vector<16x128xf32>
    %22 = arith.mulf %19, %21 : vector<16x128xf32>
    %23 = arith.addf %18, %22 : vector<16x128xf32>
    %c0_21 = arith.constant 0 : index
    %c16 = arith.constant 16 : index
    %24 = vector.load %arg5[%c0_21, %c16] : memref<18x144xf32, #tpu.memory_space<vmem>>, vector<16x128xf32>
    %c2 = arith.constant 2 : index
    %c0_22 = arith.constant 0 : index
    %25 = vector.load %arg2[%c2, %c0_22] : memref<9x128xf32, #tpu.memory_space<vmem>>, vector<1x128xf32>
    %26 = vector.broadcast %25 : vector<1x128xf32> to vector<16x128xf32>
    %27 = arith.mulf %24, %26 : vector<16x128xf32>
    %28 = arith.addf %23, %27 : vector<16x128xf32>
    %c1_23 = arith.constant 1 : index
    %c0_24 = arith.constant 0 : index
    %29 = vector.load %arg5[%c1_23, %c0_24] : memref<18x144xf32, #tpu.memory_space<vmem>>, vector<16x128xf32>
    %c3 = arith.constant 3 : index
    %c0_25 = arith.constant 0 : index
    %30 = vector.load %arg2[%c3, %c0_25] : memref<9x128xf32, #tpu.memory_space<vmem>>, vector<1x128xf32>
    %31 = vector.broadcast %30 : vector<1x128xf32> to vector<16x128xf32>
    %32 = arith.mulf %29, %31 : vector<16x128xf32>
    %33 = arith.addf %28, %32 : vector<16x128xf32>
    %c1_26 = arith.constant 1 : index
    %c8_27 = arith.constant 8 : index
    %34 = vector.load %arg5[%c1_26, %c8_27] : memref<18x144xf32, #tpu.memory_space<vmem>>, vector<16x128xf32>
    %c4 = arith.constant 4 : index
    %c0_28 = arith.constant 0 : index
    %35 = vector.load %arg2[%c4, %c0_28] : memref<9x128xf32, #tpu.memory_space<vmem>>, vector<1x128xf32>
    %36 = vector.broadcast %35 : vector<1x128xf32> to vector<16x128xf32>
    %37 = arith.mulf %34, %36 : vector<16x128xf32>
    %38 = arith.addf %33, %37 : vector<16x128xf32>
    %c1_29 = arith.constant 1 : index
    %c16_30 = arith.constant 16 : index
    %39 = vector.load %arg5[%c1_29, %c16_30] : memref<18x144xf32, #tpu.memory_space<vmem>>, vector<16x128xf32>
    %c5 = arith.constant 5 : index
    %c0_31 = arith.constant 0 : index
    %40 = vector.load %arg2[%c5, %c0_31] : memref<9x128xf32, #tpu.memory_space<vmem>>, vector<1x128xf32>
    %41 = vector.broadcast %40 : vector<1x128xf32> to vector<16x128xf32>
    %42 = arith.mulf %39, %41 : vector<16x128xf32>
    %43 = arith.addf %38, %42 : vector<16x128xf32>
    %c2_32 = arith.constant 2 : index
    %c0_33 = arith.constant 0 : index
    %44 = vector.load %arg5[%c2_32, %c0_33] : memref<18x144xf32, #tpu.memory_space<vmem>>, vector<16x128xf32>
    %c6 = arith.constant 6 : index
    %c0_34 = arith.constant 0 : index
    %45 = vector.load %arg2[%c6, %c0_34] : memref<9x128xf32, #tpu.memory_space<vmem>>, vector<1x128xf32>
    %46 = vector.broadcast %45 : vector<1x128xf32> to vector<16x128xf32>
    %47 = arith.mulf %44, %46 : vector<16x128xf32>
    %48 = arith.addf %43, %47 : vector<16x128xf32>
    %c2_35 = arith.constant 2 : index
    %c8_36 = arith.constant 8 : index
    %49 = vector.load %arg5[%c2_35, %c8_36] : memref<18x144xf32, #tpu.memory_space<vmem>>, vector<16x128xf32>
    %c7 = arith.constant 7 : index
    %c0_37 = arith.constant 0 : index
    %50 = vector.load %arg2[%c7, %c0_37] : memref<9x128xf32, #tpu.memory_space<vmem>>, vector<1x128xf32>
    %51 = vector.broadcast %50 : vector<1x128xf32> to vector<16x128xf32>
    %52 = arith.mulf %49, %51 : vector<16x128xf32>
    %53 = arith.addf %48, %52 : vector<16x128xf32>
    %c2_38 = arith.constant 2 : index
    %c16_39 = arith.constant 16 : index
    %54 = vector.load %arg5[%c2_38, %c16_39] : memref<18x144xf32, #tpu.memory_space<vmem>>, vector<16x128xf32>
    %c8_40 = arith.constant 8 : index
    %c0_41 = arith.constant 0 : index
    %55 = vector.load %arg2[%c8_40, %c0_41] : memref<9x128xf32, #tpu.memory_space<vmem>>, vector<1x128xf32>
    %56 = vector.broadcast %55 : vector<1x128xf32> to vector<16x128xf32>
    %57 = arith.mulf %54, %56 : vector<16x128xf32>
    %58 = arith.addf %53, %57 : vector<16x128xf32>
    %c0_42 = arith.constant 0 : index
    %c0_43 = arith.constant 0 : index
    %c0_44 = arith.constant 0 : index
    %59 = vector.load %arg4[%c0_42, %c0_43, %c0_44] : memref<1x16x128xf32, #tpu.memory_space<vmem>>, vector<1x16x128xf32>
    %60 = vector.shape_cast %59 : vector<1x16x128xf32> to vector<16x128xf32>
    %61 = vector.shape_cast %58 : vector<16x128xf32> to vector<1x16x128xf32>
    tpu.vector_store %arg4[%c0_42, %c0_43, %c0_44], %61 {strides = array<i32>} : memref<1x16x128xf32, #tpu.memory_space<vmem>>, vector<1x16x128xf32>,
    return
  }
  func.func @transform_0(%arg0: i32) -> (i32, i32, i32) {
    %c0_i32 = arith.constant 0 : i32
    %c0_i32_0 = arith.constant 0 : i32
    %c0_i32_1 = arith.constant 0 : i32
    return %arg0, %c0_i32, %c0_i32_0 : i32, i32, i32
  }
  func.func @transform_1(%arg0: i32) -> (i32, i32) {
    %c0_i32 = arith.constant 0 : i32
    %c0_i32_0 = arith.constant 0 : i32
    %c0_i32_1 = arith.constant 0 : i32
    return %c0_i32, %c0_i32_0 : i32, i32
  }
  func.func @transform_2(%arg0: i32) -> (i32, i32) {
    %c0_i32 = arith.constant 0 : i32
    %c0_i32_0 = arith.constant 0 : i32
    %c0_i32_1 = arith.constant 0 : i32
    return %c0_i32, %c0_i32_0 : i32, i32
  }
  func.func @transform_3(%arg0: i32) -> (i32, i32, i32) {
    %c0_i32 = arith.constant 0 : i32
    %c0_i32_0 = arith.constant 0 : i32
    %c0_i32_1 = arith.constant 0 : i32
    return %arg0, %c0_i32, %c0_i32_0 : i32, i32, i32
  }
}

</mosaic_0001>

<bundles_post_ra>
// kernel: tpu_custom_call.1
= control target key start
LH: loop header
LB: loop body
LE: loop exit
PB: predicated region body
PF: predicated region fallthrough
CT: control target
= control target key end

     0   :  { %8 = vsyncpa [#allocation4], 0  ;;  %s1214_s0 = inlined_call_operand.hbm [shape: f32[2,16,128], index: 0, kind: input, shape index: {}]   ;;  %s1215_s1 = inlined_call_operand.hbm [shape: f32[9,128], index: 1, kind: input, shape index: {}]   ;;  %s1216_s2 = inlined_call_operand.vmem [shape: f32[1,128], index: 2, kind: input, shape index: {}]   ;;  %s1217_s3 = inlined_call_operand.hbm [shape: f32[2,16,128], index: 3, kind: output, shape index: {}]  }
   0x1   :  { %10 = vsyncpa [#allocation4 + $0x1], 0 }
   0x2   :  { %11 = vsyncpa [#allocation7], 0 }
   0x3   :  { %12 = vsyncpa [#allocation5], 0 }
   0x4   :  { %14 = vsyncpa [#allocation5 + $0x1], 0  ;;  %s912_s12 = smov 0   ;;  %s914_s13 = smov 0  }
   0x5   :  { %s916_s14 = smov 0   ;;  %s918_s15 = smov 0  }
   0x6 LB: > { %s933_s16 = sadd.s32 4294967295, %s879_s15   ;;  %s664_s17 = sadd.s32 4294967294, %s879_s15   ;;  %s879_s15 = sphi %s918_s15, %s1239_s15   ;;  %s875_s14 = sphi %s916_s14, %s1238_s14   ;;  %s871_s13 = sphi %s914_s13, %s1237_s13   ;;  %s867_s12 = sphi %s912_s12, %s1236_s12  }
   0x7   : > { %p40_p0 = scmp.ne.s32.totalorder %s871_s13, %s867_s12  ;;  %p1218_p1 = scmp.eq.s32.totalorder %s933_s16, 0 }
   0x8   : > { %p112_p3 = scmp.eq.s32.totalorder %s664_s17, 1  ;;  %p665_p5 = scmp.ge.s32.totalorder %s879_s15, 1 }
   0x9   : > { %p942_p4 = por %p1218_p1, %p40_p0  ;;  %p119_p7 = scmp.lt.s32.totalorder %s879_s15, 3 }
   0xa   : > { %p947_p6 = por %p112_p3, %p40_p0  ;;  %s881_s21 = smov [#allocation6]  }
   0xb   : > { %s1222_s18 = scalar_select %p942_p4, 1, 0 }
   0xc   : > { %s1223_s19 = scalar_select %p947_p6, 1, 0 }
   0xd   : > { %p952_p8 = pnand %p665_p5, %p119_p7  ;;  %s131_s22 = sshll.u32 %s881_s21, 4  ;;  %s132_s22 = int_to_ptr.vmem [resolvable:$true] %s131_s22 }
   0xe   : > { %s966_s24 = sadd.s32 1, %s879_s15   ;;  %s27_s25 = sadd.s32 1, %s875_s14 }
   0xf   : > { %s1224_s20 = scalar_select %p952_p8, 1, 0 }
  0x10   : > { %p700_p9 = pneg %p952_p8  ;;  %s24_s26 = ssub.s32 %s879_s15, %s966_s24 }
  0x11   : > { %s768_s27 = scalar_lea.vmem %s132_s22, 256  ;;  %p776_p5 = scmp.lt.s32.totalorder %s132_s22, %s132_s22 }
  0x12   : > { %p961_p11 = pnand %p700_p9, %p1218_p1  ;;  %p769_p13 = scmp.ne.s32.totalorder %s132_s22, %s768_s27 }
  0x13   : > { %p777_p7 = scmp.lt.s32.totalorder %s768_s27, %s768_s27 }
  0x14   : > { %p759_p12 = pneg %p961_p11 }
  0x15   : > { %p778_p10 = por %p777_p7, %p776_p5 }
  0x16   : > { %p771_p0 = pnand %p769_p13, %p759_p12 }
  0x18   : > { %p772_p3 = pneg %p771_p0 }
  0x1a   : > { %p779_p2 = pnand %p778_p10, %p772_p3 }
  0x1c   : > { %782 = shalt.err (!%p779_p2)
}
  0x1d   : > { %s882_s28 = smov 128   ;;  %s883_s29 = smov 8  }
  0x1e   : > { %703 = dma.hbm_to_vmem [thread:$0]  (!%p961_p11), %s1215_s1, 256, %s132_s22, [#allocation7], %s882_s28, %s882_s28, %s883_s29  }
  0x1f   : > { %p25_p2 = scmp.eq.s32.totalorder %s24_s26, 0  ;;  %p34_p9 = scmp.ne.s32.totalorder %s875_s14, %s871_s13 }
  0x20   : > { %p35_p10 = scmp.eq.s32.totalorder %s879_s15, 0  ;;  %p713_p12 = scmp.lt.s32.totalorder %s879_s15, 2 }
  0x21   : > { %s986_s5 = scalar_select %p25_p2, %s875_s14, %s27_s25  }
  0x22   : > { %p36_p13 = por %p35_p10, %p34_p9  ;;  %p1226_p0 = scmp.eq.s32.totalorder %s933_s16, 1 }
  0x23   : > { %s148_s7 = sand.u32 1, %s875_s14   ;;  %s690_s8 = sshll.u32 %s879_s15, 8 }
  0x24   : > { %p990_p3 = por %p1226_p0, %p34_p9  ;;  %s668_s9 = sshll.u32 %s148_s7, 4 }
  0x25   : > { %s999_s17 = scalar_lea.hbm %s1214_s0, %s690_s8  ;;  %s152_s21 = scalar_lea.vmem [#allocation3], %s668_s9 }
  0x26   : > { %s1227_s6 = scalar_select %p990_p3, 1, 0 }
  0x27   : > { %s159_s22 = sshll.u32 %s152_s21, 4  ;;  %p1001_p11 = pnand %p713_p12, %p36_p13  ;;  %s1005_s22 = int_to_ptr.vmem [resolvable:$true] %s159_s22 }
  0x28   : > { %s1007_s25 = scalar_lea.sflag [#allocation4], %s148_s7  ;;  %s783_s26 = scalar_lea.hbm %s999_s17, 256 }
  0x29   : > { %p784_p5 = scmp.ne.s32.totalorder %s999_s17, %s783_s26  ;;  %p785_p7 = pneg %p1001_p11 }
  0x2a   : > { %s788_s4 = scalar_lea.hbm %s1214_s0, 512  ;;  %p789_p10 = scmp.lt.s32.totalorder %s999_s17, %s1214_s0 }
  0x2b   : > { %p786_p2 = pnand %p785_p7, %p784_p5  ;;  %p790_p12 = scmp.lt.s32.totalorder %s788_s4, %s783_s26 }
  0x2d   : > { %p787_p9 = pneg %p786_p2  ;;  %p791_p13 = por %p790_p12, %p789_p10 }
  0x2f   : > { %p792_p0 = pnand %p791_p13, %p787_p9 }
  0x31   : > { %795 = shalt.err (!%p792_p0)
}
  0x32   : > { %s796_s7 = scalar_lea.vmem %s1005_s22, 256  ;;  %s884_s10 = smov [#allocation3]  }
  0x33   : > { %p797_p1 = scmp.ne.s32.totalorder %s1005_s22, %s796_s7  ;;  %s801_s11 = sshll.u32 %s884_s10, 4  ;;  %s802_s11 = int_to_ptr.vmem [resolvable:$false] %s801_s11 }
  0x34   : > { %s803_s21 = scalar_lea.vmem %s802_s11, 512  ;;  %p804_p2 = scmp.lt.s32.totalorder %s1005_s22, %s802_s11 }
  0x35   : > { %p799_p6 = pnand %p797_p1, %p785_p7  ;;  %p805_p3 = scmp.lt.s32.totalorder %s803_s21, %s796_s7 }
  0x37   : > { %p800_p5 = pneg %p799_p6  ;;  %p806_p4 = por %p805_p3, %p804_p2 }
  0x39   : > { %p807_p8 = pnand %p806_p4, %p800_p5 }
  0x3b   : > { %810 = shalt.err (!%p807_p8)
}
  0x3c   : > { %707 = dma.hbm_to_vmem [thread:$0]  (!%p1001_p11), %s999_s17, 256, %s1005_s22, %s1007_s25, %s882_s28, %s882_s28, %s883_s29  }
  0x3d   : > { %p1229_p1 = scmp.ne.s32.totalorder %s1224_s20, 0 }
  0x3e   : > { %s1034_s26 = sand.u32 (!%p1229_p1), 1, %s871_s13   ;;  %p1230_p4 = scmp.ne.s32.totalorder (!%p1229_p1), %s1222_s18, 0 }
  0x3f   : > { %171 = sbr.rel (%p1229_p1) target bundleno = 379 (0x17b), region = 32  ;;  %s672_s27 = sshll.u32 (!%p1229_p1), %s1034_s26, 4 }
  0x40   : > { %s174_s30 = scalar_lea.sflag (!%p1229_p1), [#allocation4], %s1034_s26  ;;  %s177_s23 = scalar_lea.vmem (!%p1229_p1), [#allocation3], %s672_s27 }
  0x44   : > { %854 = dma.done.wait (%p1230_p4), %s174_s30, 256  }
  0x45   : > { %856 = vsyncadd (%p1230_p4), %s174_s30, 4294967040  ;;  %p1231_p6 = scmp.eq.s32.totalorder %s933_s16, 0 }
  0x47   : > { %858 = dma.done.wait (%p1231_p6), [#allocation7], 256   ;;  %p1232_p8 = pmov %p1231_p6 }
  0x48   : > { %v204_v0 = vlaneseq  ;;  %vm216_vm0 = vcmask 58368   ;;  %vm221_vm1 = vcmask 123968   ;;  %vm213_vm3 = vcmask 64512   ;;  %v224_v2 = vld [vmem:[%s177_s23 + $0x8] sm:$0xff]  ;;  %v223_v3 = vld [vmem:[%s177_s23] sm:$0xff]  ;;  %s886_s18 = smov 8  }
  0x49   : > { %860 = vsyncadd (%p1232_p8), [#allocation7], 4294967040  ;;  %vm218_vm4 = vcmask 130112   ;;  %v885_v1 = vmov 0.0   ;;  %v229_v4 = vrot.slane %v224_v2, 7  ;;  %v228_v5 = vrot.slane %v223_v3, 7 }
  0x4a   : > { %vm206_vm2 = vcmp.lt.s32.totalorder %v204_v0, 144  ;;  %215 = vst.msk [vmem:[#allocation2 + $0x10] sm:$0xff] %vm213_vm3, %v885_v1  ;;  %vm227_vm5 = vcmask 1040384   ;;  %v677_v6 = vld [vmem:[#allocation6 + $0x1] ss:$0 sm:$0xff]  ;;  %s887_s20 = smov 16  }
  0x4b   : > { %211 = vst.msk [vmem:[#allocation2 + $0x21] ss:$8 sm:$0x3] %vm206_vm2, %v885_v1  ;;  %208 = vst.msk [vmem:[#allocation2] ss:$8 sm:$0x3] %vm206_vm2, %v885_v1  ;;  %235 = vrot.lane.b32.xlu1 %v229_v4, %s886_s18  ;;  %231 = vrot.lane.b32.xlu0 %v228_v5, %s886_s18  ;;  %v230_v7 = vsel %vm227_vm5, %v228_v5, %v229_v4 }
  0x4c   : > { %220 = vst.msk [vmem:[#allocation2 + $0x18] sm:$0xff] %vm218_vm4, %v885_v1  ;;  %219 = vst.msk [vmem:[#allocation2 + $0x8] sm:$0xff] %vm218_vm4, %v885_v1  ;;  %v680_v8 = vld [vmem:[#allocation6 + $0x4] ss:$0 sm:$0xff]  ;;  %v678_v9 = vld [vmem:[#allocation6 + $0x2] ss:$0 sm:$0xff] }
  0x4d   : > { %217 = vst.msk [vmem:[#allocation2 + $0x20] sm:$0x3] %vm216_vm0, %v885_v1  ;;  %v683_v10 = vld [vmem:[#allocation6 + $0x7] ss:$0 sm:$0xff]  ;;  %v681_v11 = vld [vmem:[#allocation6 + $0x5] ss:$0 sm:$0xff] }
  0x4e   : > { %222 = vst.msk [vmem:[#allocation2 + $0x28] sm:$0x3] %vm221_vm1, %v885_v1  ;;  %v684_v12 = vld [vmem:[#allocation6 + $0x8] ss:$0 sm:$0xff]  ;;  %vm247_vm6 = vcmask 1040448   ;;  %vm249_vm7 = vcmask 57344  }
  0x4f   : > { %214 = vst.msk [vmem:[#allocation2] sm:$0xff] %vm213_vm3, %v885_v1  ;;  %277 = vrot.lane.b32.xlu1 %v677_v6, %s886_s18  ;;  %233 = vrot.lane.b32.xlu0 %v230_v7, %s886_s18  ;;  %vm240_vm8 = vcmask 1047617   ;;  %vm242_vm9 = vcmask 64513   ;;  %vm244_vm10 = vcmask 1047616   ;;  %s888_s28 = smov 120   ;;  %s889_s29 = smov 112  }
  0x50   : > { %v679_v38 = vld [vmem:[#allocation6 + $0x3] ss:$0 sm:$0xff]  ;;  %vm348_vm11 = vcmask 1046528   ;;  %v682_v54 = vld [vmem:[#allocation6 + $0x6] ss:$0 sm:$0xff]  ;;  %vm463_vm12 = vcmask 1045504  }
  0x51   : > { %vm296_vm13 = vcmask 982016   ;;  %vm328_vm14 = vcmask 916480   ;;  %s203_s25 = scalar_lea.vmem [#allocation8], %s672_s27  ;;  %s691_s8 = sshll.u32 %s933_s16, 8 }
  0x52   : > { %s581_s4 = sshll.u32 %s203_s25, 4  ;;  %s1170_s10 = scalar_lea.hbm %s1217_s3, %s691_s8  ;;  %s1164_s4 = int_to_ptr.vmem [resolvable:$true] %s581_s4 }
  0x53   : > { %366 = vrot.lane.b32.xlu1 %v680_v8, %s886_s18  ;;  %309 = vrot.lane.b32.xlu0 %v678_v9, %s887_s20  ;;  %s568_s11 = scalar_lea.sflag [#allocation5], %s1034_s26  ;;  %s811_s16 = scalar_lea.vmem %s1164_s4, 256 }
  0x54   : > { %p812_p3 = scmp.ne.s32.totalorder %s1164_s4, %s811_s16  ;;  %p1233_p11 = scmp.ne.s32.totalorder %s1227_s6, 0 }
  0x55   : > { %s890_s21 = smov [#allocation8]  }
  0x56   : > { %p813_p7 = pnand %p812_p3, %p1233_p11  ;;  %s815_s27 = sshll.u32 %s890_s21, 4  ;;  %s816_s27 = int_to_ptr.vmem [resolvable:$false] %s815_s27 }
  0x57   : > { %481 = vrot.lane.b32.xlu1 %v683_v10, %s886_s18  ;;  %411 = vrot.lane.b32.xlu0 %v681_v11, %s887_s20  ;;  %s817_s30 = scalar_lea.vmem %s816_s27, 512  ;;  %p818_p10 = scmp.lt.s32.totalorder %s1164_s4, %s816_s27 }
  0x58   : > { %p814_p9 = pneg %p813_p7  ;;  %p819_p12 = scmp.lt.s32.totalorder %s817_s30, %s811_s16 }
  0x5a   : > { %p820_p13 = por %p819_p12, %p818_p10 }
  0x5b   : > { %526 = vrot.lane.b32.xlu0 %v684_v12, %s887_s20 }
  0x5c   : > { %p821_p0 = pnand %p820_p13, %p814_p9 }
  0xbd   : > { %v236_v13 = vpop.permute.xlu1 %235  ;;  %v232_v14 = vpop.permute.xlu0 %231 }
  0xbe   : > { %248 = vst.msk [vmem:[#allocation2 + $0x20] sm:$0x1] %vm247_vm6, %v236_v13 }
  0xbf   : > { %250 = vst.msk [vmem:[#allocation2 + $0x28] sm:$0x1] %vm249_vm7, %v236_v13 }
  0xc0   : > { %241 = vst.msk [vmem:[#allocation2] sm:$0xfe] %vm240_vm8, %v232_v14 }
  0xc1   : > { %243 = vst.msk [vmem:[#allocation2 + $0x8] sm:$0xfe] %vm242_vm9, %v232_v14  ;;  %v234_v15 = vpop.permute.xlu0 %233  ;;  %v278_v16 = vpop.permute.xlu1 %277 }
  0xc2   : > { %245 = vst.msk [vmem:[#allocation2 + $0x10] sm:$0xff] %vm244_vm10, %v234_v15 }
  0xc3   : > { %246 = vst.msk [vmem:[#allocation2 + $0x18] sm:$0xff] %vm213_vm3, %v234_v15 }
  0xc5   : > { %v310_v21 = vpop.permute.xlu0 %309  ;;  %v367_v26 = vpop.permute.xlu1 %366  ;;  %v336_v34 = vld [vmem:[#allocation2 + $0x20] sm:$0x1] }
  0xc6   : > { %v359_v33 = vld [vmem:[#allocation2 + $0x28] sm:$0x1]  ;;  %v373_v44 = vmul.f32 %v367_v26, %v336_v34  ;;  %v344_v47 = vmul.f32 %v679_v38, %v336_v34  ;;  %v1087_v61 = vld [vmem:[#allocation2 + $0x20] sm:$0x3] }
  0xc7   : > { %v1057_v18 = vld [vmem:[#allocation2] sm:$0xff]  ;;  %v374_v43 = vmul.f32 %v367_v26, %v359_v33  ;;  %v459_v11 = vmul.f32 %v682_v54, %v1087_v61 }
  0xc8   : > { %v269_v17 = vld [vmem:[#allocation2 + $0x8] sm:$0xff]  ;;  %v280_v20 = vmul.f32 %v278_v16, %v1057_v18  ;;  %v312_v23 = vmul.f32 %v310_v21, %v1057_v18  ;;  %v335_v30 = vld [vmem:[#allocation2] sm:$0xfe]  ;;  %v387_v58 = vrot.slane %v373_v44, 1  ;;  %v352_v2 = vrot.slane %v344_v47, 1 }
  0xc9   : > { %v281_v19 = vmul.f32 %v278_v16, %v269_v17  ;;  %v313_v22 = vmul.f32 %v310_v21, %v269_v17  ;;  %v1065_v25 = vld [vmem:[#allocation2 + $0x10] sm:$0xff]  ;;  %v358_v29 = vld [vmem:[#allocation2 + $0x8] sm:$0xfe]  ;;  %v412_v35 = vpop.permute.xlu0 %411  ;;  %v369_v37 = vmul.f32 %v367_v26, %v335_v30  ;;  %v342_v46 = vmul.f32 %v679_v38, %v335_v30  ;;  %v1081_v53 = vld [vmem:[#allocation2] sm:$0xfc]  ;;  %v482_v8 = vpop.permute.xlu1 %481 }
  0xca   : > { %288 = vrot.lane.b32.xlu1 %v280_v20, %s888_s28  ;;  %v1063_v24 = vld [vmem:[#allocation2 + $0x18] sm:$0xff]  ;;  %v282_v28 = vmul.f32 %v278_v16, %v1065_v25  ;;  %v371_v32 = vmul.f32 %v367_v26, %v1065_v25  ;;  %v370_v36 = vmul.f32 %v367_v26, %v358_v29  ;;  %v314_v40 = vmul.f32 %v310_v21, %v1065_v25 }
  0xcb   : > { %290 = vrot.lane.b32.xlu0 %v281_v19, %s888_s28  ;;  %v283_v27 = vmul.f32 %v278_v16, %v1063_v24  ;;  %v372_v31 = vmul.f32 %v367_v26, %v1063_v24  ;;  %v315_v39 = vmul.f32 %v310_v21, %v1063_v24  ;;  %v415_v45 = vmul.f32 %v412_v35, %v358_v29  ;;  %v473_v19 = vld [vmem:[#allocation2 + $0x8] sm:$0xfc] }
  0xcc   : > { %v382_v42 = vrot.slane %v371_v32, 1  ;;  %v384_v48 = vrot.slane %v370_v36, 1  ;;  %v381_v49 = vrot.slane %v369_v37, 1  ;;  %v417_v50 = vmul.f32 %v412_v35, %v1063_v24 }
  0xcd   : > { %v385_v41 = vrot.slane %v372_v31, 1  ;;  %v414_v51 = vmul.f32 %v412_v35, %v335_v30  ;;  %v416_v52 = vmul.f32 %v412_v35, %v1065_v25  ;;  %v389_v57 = vrot.slane %v374_v43, 1  ;;  %v474_v30 = vld [vmem:[#allocation2 + $0x28] sm:$0x3]  ;;  %v527_v36 = vpop.permute.xlu0 %526 }
  0xce   : > { %320 = vrot.lane.b32.xlu1 %v312_v23, %s889_s29  ;;  %v383_v56 = vsel %vm348_vm11, %v381_v49, %v382_v42  ;;  %v429_v59 = vrot.slane %v415_v45, 1  ;;  %v419_v60 = vmul.f32 %v412_v35, %v359_v33  ;;  %v343_v62 = vmul.f32 %v679_v38, %v1065_v25 }
  0xcf   : > { %322 = vrot.lane.b32.xlu0 %v313_v22, %s889_s29  ;;  %v386_v55 = vsel %vm348_vm11, %v384_v48, %v385_v41  ;;  %v349_v63 = vrot.slane %v342_v46, 1  ;;  %v430_v0 = vrot.slane %v417_v50, 1  ;;  %v426_v1 = vrot.slane %v414_v51, 1 }
  0xd0   : > { %v457_v3 = vmul.f32 %v682_v54, %v1081_v53  ;;  %v427_v4 = vrot.slane %v416_v52, 1  ;;  %v418_v5 = vmul.f32 %v412_v35, %v336_v34  ;;  %v350_v6 = vrot.slane %v343_v62, 1 }
  0xd1   : > { %v458_v7 = vmul.f32 %v682_v54, %v1065_v25  ;;  %v390_v9 = vsel %vm348_vm11, %v385_v41, %v389_v57  ;;  %v388_v10 = vsel %vm348_vm11, %v382_v42, %v387_v58  ;;  %v431_v16 = vsel %vm348_vm11, %v429_v59, %v430_v0 }
  0xd2   : > { %292 = vrot.lane.b32.xlu1 %v282_v28, %s888_s28  ;;  %v1098_v12 = vsel %vm348_vm11, %v349_v63, %v350_v6  ;;  %v1101_v13 = vsel %vm348_vm11, %v350_v6, %v352_v2  ;;  %v464_v14 = vrot.slane %v457_v3, 2  ;;  %v434_v17 = vrot.slane %v419_v60, 1 }
  0xd3   : > { %294 = vrot.lane.b32.xlu0 %v283_v27, %s888_s28  ;;  %v465_v15 = vrot.slane %v458_v7, 2  ;;  %v467_v20 = vrot.slane %v459_v11, 2  ;;  %v428_v21 = vsel %vm348_vm11, %v426_v1, %v427_v4  ;;  %v432_v22 = vrot.slane %v418_v5, 1 }
  0xd4   : > { %v485_v23 = vmul.f32 %v482_v8, %v473_v19  ;;  %v487_v27 = vmul.f32 %v482_v8, %v1063_v24  ;;  %v484_v28 = vmul.f32 %v482_v8, %v1081_v53  ;;  %v486_v29 = vmul.f32 %v482_v8, %v1065_v25 }
  0xd5   : > { %v1106_v26 = vsel %vm463_vm12, %v464_v14, %v465_v15  ;;  %v1112_v31 = vsel %vm463_vm12, %v465_v15, %v467_v20  ;;  %v435_v32 = vsel %vm348_vm11, %v430_v0, %v434_v17  ;;  %v433_v33 = vsel %vm348_vm11, %v427_v4, %v432_v22  ;;  %v675_v0 = vld [vmem:[%s1216_s2] ss:$0 sm:$0xff] }
  0xd6   : > { %324 = vrot.lane.b32.xlu1 %v314_v40, %s889_s29  ;;  %v489_v34 = vmul.f32 %v482_v8, %v474_v30  ;;  %v488_v35 = vmul.f32 %v482_v8, %v1087_v61  ;;  %v499_v37 = vrot.slane %v485_v23, 2  ;;  %v500_v38 = vrot.slane %v487_v27, 2 }
  0xd7   : > { %326 = vrot.lane.b32.xlu0 %v315_v39, %s889_s29  ;;  %v496_v39 = vrot.slane %v484_v28, 2  ;;  %v497_v40 = vrot.slane %v486_v29, 2  ;;  %v530_v43 = vmul.f32 %v527_v36, %v473_v19  ;;  %v532_v44 = vmul.f32 %v527_v36, %v1063_v24 }
  0xd8   : > { %v504_v41 = vrot.slane %v489_v34, 2  ;;  %v502_v42 = vrot.slane %v488_v35, 2  ;;  %v501_v45 = vsel %vm463_vm12, %v499_v37, %v500_v38  ;;  %v529_v47 = vmul.f32 %v527_v36, %v1081_v53 }
  0xd9   : > { %v498_v46 = vsel %vm463_vm12, %v496_v39, %v497_v40  ;;  %v531_v48 = vmul.f32 %v527_v36, %v1065_v25  ;;  %v544_v51 = vrot.slane %v530_v43, 2  ;;  %v545_v52 = vrot.slane %v532_v44, 2 }
  0xda   : > { %391 = vrot.lane.b32.xlu1 %v383_v56, %s888_s28  ;;  %v505_v49 = vsel %vm463_vm12, %v500_v38, %v504_v41  ;;  %v503_v50 = vsel %vm463_vm12, %v497_v40, %v502_v42  ;;  %v541_v54 = vrot.slane %v529_v47, 2  ;;  %v533_v56 = vmul.f32 %v527_v36, %v1087_v61  ;;  %v676_v61 = vld [vmem:[#allocation6] ss:$0 sm:$0xff] }
  0xdb   : > { %393 = vrot.lane.b32.xlu0 %v386_v55, %s888_s28  ;;  %v542_v24 = vrot.slane %v531_v48, 2  ;;  %v534_v55 = vmul.f32 %v527_v36, %v474_v30  ;;  %v546_v53 = vsel %vm463_vm12, %v544_v51, %v545_v52  ;;  %v265_v63 = vmul.f32 %v676_v61, %v1057_v18 }
  0xdc   : > { %v547_v59 = vrot.slane %v533_v56, 2 }
  0xdd   : > { %v543_v57 = vsel %vm463_vm12, %v541_v54, %v542_v24  ;;  %v549_v58 = vrot.slane %v534_v55, 2  ;;  %v267_v4 = vadd.f32 %v675_v0, %v265_v63 }
  0xde   : > { %395 = vrot.lane.b32.xlu1 %v388_v10, %s888_s28  ;;  %v548_v62 = vsel %vm463_vm12, %v542_v24, %v547_v59  ;;  %v266_v10 = vmul.f32 %v676_v61, %v1065_v25 }
  0xdf   : > { %397 = vrot.lane.b32.xlu0 %v390_v9, %s888_s28  ;;  %v550_v60 = vsel %vm463_vm12, %v545_v52, %v549_v58 }
  0xe2   : > { %436 = vrot.lane.b32.xlu1 %v428_v21, %s889_s29 }
  0xe3   : > { %438 = vrot.lane.b32.xlu0 %v431_v16, %s889_s29  ;;  %v268_v16 = vadd.f32 %v675_v0, %v266_v10 }
  0xe6   : > { %440 = vrot.lane.b32.xlu1 %v433_v33, %s889_s29 }
  0xe7   : > { %442 = vrot.lane.b32.xlu0 %v435_v32, %s889_s29 }
  0xea   : > { %506 = vrot.lane.b32.xlu1 %v498_v46, %s888_s28 }
  0xeb   : > { %508 = vrot.lane.b32.xlu0 %v501_v45, %s888_s28 }
  0xee   : > { %510 = vrot.lane.b32.xlu1 %v503_v50, %s888_s28 }
  0xef   : > { %512 = vrot.lane.b32.xlu0 %v505_v49, %s888_s28 }
  0xf2   : > { %551 = vrot.lane.b32.xlu1 %v543_v57, %s889_s29 }
  0xf3   : > { %553 = vrot.lane.b32.xlu0 %v546_v53, %s889_s29 }
  0xf6   : > { %555 = vrot.lane.b32.xlu1 %v548_v62, %s889_s29 }
  0xf7   : > { %557 = vrot.lane.b32.xlu0 %v550_v60, %s889_s29 }
 0x13c   : > { %v289_v2 = vpop.permute.xlu1 %288 }
 0x13d   : > { %v291_v1 = vpop.permute.xlu0 %290 }
 0x13e   : > { %v297_v3 = vsel %vm296_vm13, %v289_v2, %v291_v1 }
 0x13f   : > { %v301_v5 = vadd.f32 %v297_v3, %v267_v4 }
 0x140   : > { %v321_v7 = vpop.permute.xlu1 %320 }
 0x141   : > { %v323_v6 = vpop.permute.xlu0 %322 }
 0x142   : > { %v329_v8 = vsel %vm328_vm14, %v321_v7, %v323_v6 }
 0x143   : > { %v333_v9 = vadd.f32 %v329_v8, %v301_v5 }
 0x144   : > { %v293_v18 = vpop.permute.xlu1 %292 }
 0x145   : > { %v295_v11 = vpop.permute.xlu0 %294  ;;  %v356_v14 = vadd.f32 %v1098_v12, %v333_v9 }
 0x146   : > { %v298_v15 = vsel %vm296_vm13, %v293_v18, %v295_v11 }
 0x147   : > { %v302_v17 = vadd.f32 %v298_v15, %v268_v16 }
 0x148   : > { %v325_v20 = vpop.permute.xlu1 %324 }
 0x149   : > { %v327_v19 = vpop.permute.xlu0 %326 }
 0x14a   : > { %v330_v21 = vsel %vm328_vm14, %v325_v20, %v327_v19 }
 0x14b   : > { %v334_v22 = vadd.f32 %v330_v21, %v302_v17 }
 0x14c   : > { %v392_v27 = vpop.permute.xlu1 %391 }
 0x14d   : > { %v394_v23 = vpop.permute.xlu0 %393  ;;  %v357_v28 = vadd.f32 %v1101_v13, %v334_v22 }
 0x14e   : > { %v399_v25 = vsel %vm296_vm13, %v392_v27, %v394_v23 }
 0x14f   : > { %v403_v32 = vadd.f32 %v399_v25, %v356_v14 }
 0x150   : > { %v396_v30 = vpop.permute.xlu1 %395 }
 0x151   : > { %v398_v29 = vpop.permute.xlu0 %397 }
 0x152   : > { %v400_v34 = vsel %vm296_vm13, %v396_v30, %v398_v29 }
 0x153   : > { %v404_v37 = vadd.f32 %v400_v34, %v357_v28 }
 0x154   : > { %v437_v12 = vpop.permute.xlu1 %436 }
 0x155   : > { %v439_v33 = vpop.permute.xlu0 %438 }
 0x156   : > { %v444_v35 = vsel %vm328_vm14, %v437_v12, %v439_v33 }
 0x157   : > { %v448_v36 = vadd.f32 %v444_v35, %v403_v32 }
 0x158   : > { %v441_v39 = vpop.permute.xlu1 %440 }
 0x159   : > { %v443_v38 = vpop.permute.xlu0 %442  ;;  %v471_v40 = vadd.f32 %v1106_v26, %v448_v36 }
 0x15a   : > { %v445_v13 = vsel %vm328_vm14, %v441_v39, %v443_v38 }
 0x15b   : > { %v449_v41 = vadd.f32 %v445_v13, %v404_v37 }
 0x15c   : > { %v507_v43 = vpop.permute.xlu1 %506 }
 0x15d   : > { %v509_v42 = vpop.permute.xlu0 %508  ;;  %v472_v44 = vadd.f32 %v1112_v31, %v449_v41 }
 0x15e   : > { %v514_v47 = vsel %vm296_vm13, %v507_v43, %v509_v42 }
 0x15f   : > { %v518_v48 = vadd.f32 %v514_v47, %v471_v40 }
 0x160   : > { %v511_v46 = vpop.permute.xlu1 %510 }
 0x161   : > { %v513_v45 = vpop.permute.xlu0 %512 }
 0x162   : > { %v515_v51 = vsel %vm296_vm13, %v511_v46, %v513_v45 }
 0x163   : > { %v519_v54 = vadd.f32 %v515_v51, %v472_v44 }
 0x164   : > { %v552_v50 = vpop.permute.xlu1 %551 }
 0x165   : > { %v554_v49 = vpop.permute.xlu0 %553 }
 0x166   : > { %v559_v26 = vsel %vm328_vm14, %v552_v50, %v554_v49 }
 0x167   : > { %v563_v52 = vadd.f32 %v559_v26, %v518_v48 }
 0x168   : > { %v556_v24 = vpop.permute.xlu1 %555 }
 0x169   : > { %565 = vst [vmem:[%s203_s25] sm:$0xff] %v563_v52  ;;  %v558_v31 = vpop.permute.xlu0 %557 }
 0x16a   : > { %v560_v55 = vsel %vm328_vm14, %v556_v24, %v558_v31 }
 0x16b   : > { %v564_v56 = vadd.f32 %v560_v55, %v519_v54 }
 0x16d   : > { %566 = vst [vmem:[%s203_s25 + $0x8] sm:$0xff] %v564_v56 }
 0x16e   : > { %824 = shalt.err (!%p821_p0)
}
 0x16f   : > { %s825_s23 = scalar_lea.hbm %s1170_s10, 256  ;;  %s829_s29 = scalar_lea.hbm %s1217_s3, 512 }
 0x170   : > { %p826_p5 = scmp.ne.s32.totalorder %s1170_s10, %s825_s23  ;;  %p830_p4 = scmp.lt.s32.totalorder %s1170_s10, %s1217_s3 }
 0x171   : > { %p831_p6 = scmp.lt.s32.totalorder %s829_s29, %s825_s23 }
 0x172   : > { %p827_p2 = pnand %p826_p5, %p1233_p11 }
 0x173   : > { %p832_p8 = por %p831_p6, %p830_p4 }
 0x174   : > { %p828_p1 = pneg %p827_p2 }
 0x176   : > { %p833_p3 = pnand %p832_p8, %p828_p1 }
 0x178   : > { %836 = shalt.err (!%p833_p3)
}
 0x179   : > { %s891_s25 = smov 128  }
 0x17a   : > { %698 = dma.vmem_to_hbm [thread:$0]  (%p1233_p11), %s1164_s4, 256, %s1170_s10, %s568_s11, %s891_s25, %s891_s25, %s886_s18  }
 0x17b PF: > { %s596_s8 = sand.u32 1, %s867_s12   ;;  %p1234_p7 = scmp.ne.s32.totalorder %s1223_s19, 0 }
 0x17c   : > { %p1235_p9 = scmp.ge.s32.totalorder %s879_s15, 2  ;;  %s597_s9 = scalar_lea.sflag [#allocation5], %s596_s8 }
 0x17e   : > { %p709_p10 = pnand %p1235_p9, %p1234_p7 }
 0x180   : > { %p710_p12 = pneg %p709_p10 }
 0x182   : > { %862 = dma.done.wait (%p710_p12), %s597_s9, 256  }
 0x183   : > { %864 = vsyncadd (%p710_p12), %s597_s9, 4294967040  ;;  %p17_p13 = scmp.ge.s32.totalorder %s966_s24, 4   ;;  %s1236_s12 = smov %s871_s13 }
 0x184   : > { %s1237_s13 = smov %s875_s14  ;;  %s1238_s14 = smov %s986_s5 }
 0x185   : > { %s1239_s15 = smov %s966_s24  ;;  %19 = sbr.rel (!%p17_p13) target bundleno = 6 (0x6), region = 82 }
 0x18a   :  { %602 = vsyncpa [#allocation4], 1 }
 0x18b   :  { %604 = vsyncpa [#allocation4 + $0x1], 1 }
 0x18c   :  { %605 = vsyncpa [#allocation7], 1 }
 0x18d   :  { %606 = vsyncpa [#allocation5], 1 }
 0x18e   :  { %608 = vsyncpa [#allocation5 + $0x1], 1 }

</bundles_post_ra>
